<compile_context>
chip_gen: v6e
topology: v6e:2x2x1
jax: 0.10.0
libtpu: 0.0.40
codegen_flags: <defaults>
</compile_context>

<pallas_src>
import jax
import jax.numpy as jnp
from jax.experimental import pallas as pl
from jax.experimental.pallas import tpu as pltpu

SUBLANE = 8  # f32 sublane granularity


def _round_up(n, m):
    return (n + m - 1) // m * m


def _dnn_kernel(x_ref, w1_ref, b1_ref, w2_ref, b2_ref, w3_ref, b3_ref, o_ref):
    # x_ref: (bm, in_dim) f32;  w*: (fan_in, fan_out) bf16;  b*: (1, fan_out) f32
    x = x_ref[...].astype(jnp.bfloat16)                      # bf16 only at MXU input
    h1 = jnp.dot(x, w1_ref[...], preferred_element_type=jnp.float32)
    h1 = jnp.maximum(h1 + b1_ref[...], 0.0)                  # f32 bias + ReLU (VPU)
    h2 = jnp.dot(h1.astype(jnp.bfloat16), w2_ref[...],
                 preferred_element_type=jnp.float32)
    h2 = jnp.maximum(h2 + b2_ref[...], 0.0)
    y = jnp.dot(h2.astype(jnp.bfloat16), w3_ref[...],
                preferred_element_type=jnp.float32)
    o_ref[...] = (y + b3_ref[...]).astype(o_ref.dtype)


@jax.jit
def dnn_forward(x, params):
    """x: (batch, in_dim) f32; params: logical-shape bf16 weights / f32 biases."""
    w1, b1 = params["w1"], params["b1"]
    w2, b2 = params["w2"], params["b2"]
    w3, b3 = params["w3"], params["b3"]

    batch, in_dim = x.shape
    hid = w1.shape[1]
    out_dim = w3.shape[1]

    # Pad batch only to the sublane granularity (<= 7 wasted rows).
    batch_p = _round_up(batch, SUBLANE)
    if batch_p != batch:
        x = jnp.pad(x, ((0, batch_p - batch), (0, 0)))

    # Batch tile: large tiles (amortize ~0.35 us/step), but guarantee >= 2 grid
    # steps when possible so both v7x TensorCores get work.  Ragged last block
    # is safe: computation is purely row-wise and extra rows are sliced off.
    bm = min(1024, max(SUBLANE, _round_up(pl.cdiv(batch_p, 2), SUBLANE)))
    grid = (pl.cdiv(batch_p, bm),)

    # Constant block index -> DMA'd once, VMEM-resident for every batch tile.
    pinned = lambda a: pl.BlockSpec(a.shape, lambda i: (0,) * a.ndim)

    cost = pl.CostEstimate(
        flops=2 * batch_p * (in_dim * hid + hid * hid + hid * out_dim),
        transcendentals=0,
        bytes_accessed=(x.size * x.dtype.itemsize
                        + batch_p * out_dim * 4
                        + sum(a.size * a.dtype.itemsize
                              for a in (w1, b1, w2, b2, w3, b3))),
    )

    y = pl.pallas_call(
        _dnn_kernel,
        out_shape=jax.ShapeDtypeStruct((batch_p, out_dim), jnp.float32),
        grid=grid,
        in_specs=[
            pl.BlockSpec((bm, in_dim), lambda i: (i, 0)),   # full-extent last dim
            pinned(w1), pinned(b1),
            pinned(w2), pinned(b2),
            pinned(w3), pinned(b3),
        ],
        out_specs=pl.BlockSpec((bm, out_dim), lambda i: (i, 0)),
        compiler_params=pltpu.CompilerParams(
            dimension_semantics=("parallel",)),  # batch tiles split across v7x TCs
        cost_estimate=cost,
    )(x, w1, b1, w2, b2, w3, b3)

    return y[:batch]


def init_params(key, in_dim, hidden_dim, out_dim):
    """nn.Linear-style U(-1/sqrt(fan_in), 1/sqrt(fan_in)) init.

    Weights stored (fan_in, fan_out) (transposed vs. PyTorch's (out, in)) at
    their logical, unpadded shapes, bf16 for the MXU.  Biases (1, fan_out) f32.
    """
    keys = jax.random.split(key, 6)

    def linear(kw, kb, fan_in, fan_out):
        bound = 1.0 / (fan_in ** 0.5)
        w = jax.random.uniform(kw, (fan_in, fan_out), jnp.float32, -bound, bound)
        b = jax.random.uniform(kb, (1, fan_out), jnp.float32, -bound, bound)
        return w.astype(jnp.bfloat16), b

    w1, b1 = linear(keys[0], keys[1], in_dim, hidden_dim)
    w2, b2 = linear(keys[2], keys[3], hidden_dim, hidden_dim)
    w3, b3 = linear(keys[4], keys[5], hidden_dim, out_dim)
    return {"w1": w1, "b1": b1, "w2": w2, "b2": b2, "w3": w3, "b3": b3}


def dnn_reference(x, params):
    """Pure-JAX reference mirroring the kernel's bf16-at-MXU / f32-accumulate
    precision (PyTorch forward semantics modulo bf16 operand rounding)."""
    def lin(a, w, b):
        return jnp.dot(a.astype(jnp.bfloat16), w,
                       preferred_element_type=jnp.float32) + b

    h1 = jax.nn.relu(lin(x, params["w1"], params["b1"]))
    h2 = jax.nn.relu(lin(h1, params["w2"], params["b2"]))
    return lin(h2, params["w3"], params["b3"])


if __name__ == "__main__":
    in_dim, hidden_dim, out_dim = 4, 32, 2
    batch = 8

    key = jax.random.PRNGKey(0)
    k_params, k_x = jax.random.split(key)
    params = init_params(k_params, in_dim, hidden_dim, out_dim)
    x = jax.random.normal(k_x, (batch, in_dim), dtype=jnp.float32)

    y = dnn_forward(x, params)
    jax.block_until_ready(y)

    y_ref = dnn_reference(x, params)
    assert y.shape == (batch, out_dim), y.shape
    assert jnp.allclose(y, y_ref, atol=1e-3, rtol=1e-3), float(
        jnp.max(jnp.abs(y - y_ref)))

    print("KERNEL_OK")
</pallas_src>

<mosaic_0001>
module attributes {stable_mosaic.version = 11 : i64} {
  func.func @_dnn_kernel(%arg0: i32, %arg1: memref<8x4xf32, #tpu.memory_space<vmem>>, %arg2: memref<4x32xbf16, #tpu.memory_space<vmem>>, %arg3: memref<1x32xf32, #tpu.memory_space<vmem>>, %arg4: memref<32x32xbf16, #tpu.memory_space<vmem>>, %arg5: memref<1x32xf32, #tpu.memory_space<vmem>>, %arg6: memref<32x2xbf16, #tpu.memory_space<vmem>>, %arg7: memref<1x2xf32, #tpu.memory_space<vmem>>, %arg8: memref<8x2xf32, #tpu.memory_space<vmem>>) attributes {dimension_semantics = [#tpu.dimension_semantics<parallel>], iteration_bounds = array<i64: 1>, scalar_prefetch = 0 : i64, scratch_operands = 0 : i64, tpu.core_type = #tpu.core_type<tc>, window_params = [{transform_indices = @transform_0, window_bounds = array<i64: 8, 4>}, {pipeline_mode = #tpu.pipeline_mode<synchronous>, transform_indices = @transform_1, window_bounds = array<i64: 4, 32>}, {pipeline_mode = #tpu.pipeline_mode<synchronous>, transform_indices = @transform_2, window_bounds = array<i64: 1, 32>}, {pipeline_mode = #tpu.pipeline_mode<synchronous>, transform_indices = @transform_3, window_bounds = array<i64: 32, 32>}, {pipeline_mode = #tpu.pipeline_mode<synchronous>, transform_indices = @transform_4, window_bounds = array<i64: 1, 32>}, {pipeline_mode = #tpu.pipeline_mode<synchronous>, transform_indices = @transform_5, window_bounds = array<i64: 32, 2>}, {pipeline_mode = #tpu.pipeline_mode<synchronous>, transform_indices = @transform_6, window_bounds = array<i64: 1, 2>}, {transform_indices = @transform_7, window_bounds = array<i64: 8, 2>}]} {
    %c0 = arith.constant 0 : index
    %c0_0 = arith.constant 0 : index
    %0 = vector.load %arg1[%c0, %c0_0] : memref<8x4xf32, #tpu.memory_space<vmem>>, vector<8x4xf32>
    %1 = arith.truncf %0 : vector<8x4xf32> to vector<8x4xbf16>
    %c0_1 = arith.constant 0 : index
    %c0_2 = arith.constant 0 : index
    %2 = vector.load %arg2[%c0_1, %c0_2] : memref<4x32xbf16, #tpu.memory_space<vmem>>, vector<4x32xbf16>
    %cst = arith.constant dense<0.000000e+00> : vector<8x32xf32>
    %3 = tpu.matmul %1, %2, %cst {dimension_numbers = #tpu.dot_dimension_numbers<[1], [0], [0], [1], [0, 0, 1, 1], [], []>} : vector<8x4xbf16>, vector<4x32xbf16>, vector<8x32xf32> -> vector<8x32xf32>
    %c0_3 = arith.constant 0 : index
    %c0_4 = arith.constant 0 : index
    %4 = vector.load %arg3[%c0_3, %c0_4] : memref<1x32xf32, #tpu.memory_space<vmem>>, vector<1x32xf32>
    %5 = vector.broadcast %4 : vector<1x32xf32> to vector<8x32xf32>
    %6 = arith.addf %3, %5 : vector<8x32xf32>
    %cst_5 = arith.constant 0.000000e+00 : f32
    %7 = vector.broadcast %cst_5 : f32 to vector<8x32xf32>
    %8 = arith.maximumf %6, %7 : vector<8x32xf32>
    %9 = arith.truncf %8 : vector<8x32xf32> to vector<8x32xbf16>
    %c0_6 = arith.constant 0 : index
    %c0_7 = arith.constant 0 : index
    %10 = vector.load %arg4[%c0_6, %c0_7] : memref<32x32xbf16, #tpu.memory_space<vmem>>, vector<32x32xbf16>
    %cst_8 = arith.constant dense<0.000000e+00> : vector<8x32xf32>
    %11 = tpu.matmul %9, %10, %cst_8 {dimension_numbers = #tpu.dot_dimension_numbers<[1], [0], [0], [1], [0, 0, 1, 1], [], []>} : vector<8x32xbf16>, vector<32x32xbf16>, vector<8x32xf32> -> vector<8x32xf32>
    %c0_9 = arith.constant 0 : index
    %c0_10 = arith.constant 0 : index
    %12 = vector.load %arg5[%c0_9, %c0_10] : memref<1x32xf32, #tpu.memory_space<vmem>>, vector<1x32xf32>
    %13 = vector.broadcast %12 : vector<1x32xf32> to vector<8x32xf32>
    %14 = arith.addf %11, %13 : vector<8x32xf32>
    %cst_11 = arith.constant 0.000000e+00 : f32
    %15 = vector.broadcast %cst_11 : f32 to vector<8x32xf32>
    %16 = arith.maximumf %14, %15 : vector<8x32xf32>
    %17 = arith.truncf %16 : vector<8x32xf32> to vector<8x32xbf16>
    %c0_12 = arith.constant 0 : index
    %c0_13 = arith.constant 0 : index
    %18 = vector.load %arg6[%c0_12, %c0_13] : memref<32x2xbf16, #tpu.memory_space<vmem>>, vector<32x2xbf16>
    %cst_14 = arith.constant dense<0.000000e+00> : vector<8x2xf32>
    %19 = tpu.matmul %17, %18, %cst_14 {dimension_numbers = #tpu.dot_dimension_numbers<[1], [0], [0], [1], [0, 0, 1, 1], [], []>} : vector<8x32xbf16>, vector<32x2xbf16>, vector<8x2xf32> -> vector<8x2xf32>
    %c0_15 = arith.constant 0 : index
    %c0_16 = arith.constant 0 : index
    %20 = vector.load %arg7[%c0_15, %c0_16] : memref<1x2xf32, #tpu.memory_space<vmem>>, vector<1x2xf32>
    %21 = vector.broadcast %20 : vector<1x2xf32> to vector<8x2xf32>
    %22 = arith.addf %19, %21 : vector<8x2xf32>
    %c0_17 = arith.constant 0 : index
    %c0_18 = arith.constant 0 : index
    %23 = vector.load %arg8[%c0_17, %c0_18] : memref<8x2xf32, #tpu.memory_space<vmem>>, vector<8x2xf32>
    tpu.vector_store %arg8[%c0_17, %c0_18], %22 {strides = array<i32>} : memref<8x2xf32, #tpu.memory_space<vmem>>, vector<8x2xf32>,
    return
  }
  func.func @transform_0(%arg0: i32) -> (i32, i32) {
    %c0_i32 = arith.constant 0 : i32
    %c0_i32_0 = arith.constant 0 : i32
    return %arg0, %c0_i32 : i32, i32
  }
  func.func @transform_1(%arg0: i32) -> (i32, i32) {
    %c0_i32 = arith.constant 0 : i32
    %c0_i32_0 = arith.constant 0 : i32
    %c0_i32_1 = arith.constant 0 : i32
    return %c0_i32, %c0_i32_0 : i32, i32
  }
  func.func @transform_2(%arg0: i32) -> (i32, i32) {
    %c0_i32 = arith.constant 0 : i32
    %c0_i32_0 = arith.constant 0 : i32
    %c0_i32_1 = arith.constant 0 : i32
    return %c0_i32, %c0_i32_0 : i32, i32
  }
  func.func @transform_3(%arg0: i32) -> (i32, i32) {
    %c0_i32 = arith.constant 0 : i32
    %c0_i32_0 = arith.constant 0 : i32
    %c0_i32_1 = arith.constant 0 : i32
    return %c0_i32, %c0_i32_0 : i32, i32
  }
  func.func @transform_4(%arg0: i32) -> (i32, i32) {
    %c0_i32 = arith.constant 0 : i32
    %c0_i32_0 = arith.constant 0 : i32
    %c0_i32_1 = arith.constant 0 : i32
    return %c0_i32, %c0_i32_0 : i32, i32
  }
  func.func @transform_5(%arg0: i32) -> (i32, i32) {
    %c0_i32 = arith.constant 0 : i32
    %c0_i32_0 = arith.constant 0 : i32
    %c0_i32_1 = arith.constant 0 : i32
    return %c0_i32, %c0_i32_0 : i32, i32
  }
  func.func @transform_6(%arg0: i32) -> (i32, i32) {
    %c0_i32 = arith.constant 0 : i32
    %c0_i32_0 = arith.constant 0 : i32
    %c0_i32_1 = arith.constant 0 : i32
    return %c0_i32, %c0_i32_0 : i32, i32
  }
  func.func @transform_7(%arg0: i32) -> (i32, i32) {
    %c0_i32 = arith.constant 0 : i32
    %c0_i32_0 = arith.constant 0 : i32
    return %arg0, %c0_i32 : i32, i32
  }
}

</mosaic_0001>

<bundles_post_ra>
// kernel: dnn_forward.1
= control target key start
LH: loop header
LB: loop body
LE: loop exit
PB: predicated region body
PF: predicated region fallthrough
CT: control target
= control target key end

     0   :  { %vm41_vm0 = vcmask 1041408   ;;  %v274_v0 = vmov 0.0   ;;  %vm275_vm1 = vmmov 0   ;;  %vm37_vm2 = vcmask 31744   ;;  %s346_s1 = inlined_call_operand.vmem [shape: bf16[4,32], index: 1, kind: input, shape index: {}]   ;;  %s347_s0 = inlined_call_operand.vmem [shape: f32[8,4], index: 0, kind: input, shape index: {}]   ;;  %s348_s3 = inlined_call_operand.vmem [shape: bf16[32,32], index: 3, kind: input, shape index: {}]   ;;  %s349_s5 = inlined_call_operand.vmem [shape: bf16[32,2], index: 5, kind: input, shape index: {}]   ;;  %s350_s2 = inlined_call_operand.vmem [shape: f32[1,32], index: 2, kind: input, shape index: {}]   ;;  %s351_s4 = inlined_call_operand.vmem [shape: f32[1,32], index: 4, kind: input, shape index: {}]   ;;  %s352_s6 = inlined_call_operand.vmem [shape: f32[1,2], index: 6, kind: input, shape index: {}]   ;;  %s353_s7 = inlined_call_operand.vmem [shape: f32[8,2], index: 7, kind: output, shape index: {}]  }
   0x1   :  { %246 = vmatprep.subr.bf16.mxu0 %v274_v0  ;;  %v29_v1 = vld [vmem:[%s346_s1] sm:$0x3]  ;;  %248 = vmatprep.mubr.msk.bf16.mxu0 %vm275_vm1, %v274_v0  ;;  %v270_v5 = vld [vmem:[%s348_s3 + $0x8] sm:$0xff]   ;;  %vm110_vm3 = vcmask 261120   ;;  %vm222_vm4 = vcmask 15360  }
   0x2   :  { %v27_v2 = vld [vmem:[%s347_s0] sm:$0xff]  ;;  %v43_v3 = vsel %vm41_vm0, %v29_v1, 0  ;;  %252 = vmatprep.subr.bf16.mxu1 %v274_v0  ;;  %256 = vmatprep.mubr.msk.bf16.mxu1 %vm275_vm1, %v274_v0  ;;  %v272_v7 = vld [vmem:[%s349_s5 + $0x8] sm:$0xff]  }
   0x3   :  { %v28_v4 = vpack.c.bf16 %v27_v2, %v27_v2  ;;  %247 = vmatpush3.bf16.msra.mxu0 %v43_v3  ;;  %253 = vmatpush3.bf16.msra.mxu1 %v270_v5  ;;  %v271_v6 = vld [vmem:[%s348_s3] sm:$0xff]  }
   0x4   :  { %260 = vmatprep.subr.bf16.mxu0 %v274_v0  ;;  %254 = vmatprep.subr.bf16.mxu1 %v274_v0  ;;  %v228_v8 = vld [vmem:[%s350_s2] ss:$0 sm:$0xff] }
   0x5   :  { %v273_v16 = vld [vmem:[%s349_s5] sm:$0xff]  }
   0x6   :  { %249 = vmatmul.mubr.msk.bf16.vlgmr.msra.gmra.mxu0 %vm37_vm2, %v28_v4  ;;  %v230_v17 = vld [vmem:[%s351_s4] ss:$0 sm:$0xff] }
   0x7   :  { %264 = vmatprep.mubr.msk.bf16.mxu0 %vm275_vm1, %v274_v0  ;;  %255 = vmatpush3.bf16.msra.mxu1 %v271_v6  ;;  %v234_v25 = vld [vmem:[%s352_s6] ss:$0 sm:$0xff] }
   0x8   :  { %261 = vmatpush3.bf16.msra.mxu0 %v272_v7 }
   0x9   :  { %262 = vmatprep.subr.bf16.mxu0 %v274_v0 }
   0xc   :  { %263 = vmatpush3.bf16.msra.mxu0 %v273_v16 }
  0xc6   :  { %v79_v9 = vpop.f32.mrf.mxu0 }
  0xc7   :  { %v80_v10 = vadd.f32 %v228_v8, %v79_v9 }
  0xc8   :  { %v250_v11 = vpop.f32.mrf.mxu0 }
  0xc9   :  { %v85_v12 = vmax.f32 %v80_v10, 0.0 }
  0xca   :  { %v82_v13 = vpop.f32.mrf.mxu0 }
  0xcb   :  { %v86_v14 = vpack.c.bf16 %v85_v12, %v85_v12 }
  0xcc   :  { %v251_v15 = vpop.f32.mrf.mxu0 }
  0xcd   :  { %257 = vmatmul.mubr.msk.bf16.vlgmr.msra.gmra.mxu1 %vm110_vm3, %v86_v14 }
 0x18d   :  { %v148_v18 = vpop.f32.mrf.mxu1 }
 0x18e   :  { %v149_v19 = vadd.f32 %v230_v17, %v148_v18 }
 0x18f   :  { %v258_v20 = vpop.f32.mrf.mxu1 }
 0x190   :  { %v154_v21 = vmax.f32 %v149_v19, 0.0 }
 0x191   :  { %v151_v22 = vpop.f32.mrf.mxu1 }
 0x192   :  { %v155_v23 = vpack.c.bf16 %v154_v21, %v154_v21 }
 0x193   :  { %v259_v24 = vpop.f32.mrf.mxu1 }
 0x194   :  { %265 = vmatmul.mubr.msk.bf16.vlgmr.msra.gmra.mxu0 %vm110_vm3, %v155_v23 }
 0x254   :  { %v216_v26 = vpop.f32.mrf.mxu0 }
 0x255   :  { %v217_v27 = vadd.f32 %v234_v25, %v216_v26 }
 0x256   :  { %v266_v28 = vpop.f32.mrf.mxu0 }
 0x257   :  { %223 = vst.msk [vmem:[%s353_s7] sm:$0xff] %vm222_vm4, %v217_v27 }
 0x258   :  { %v219_v29 = vpop.f32.mrf.mxu0 }
 0x25a   :  { %v267_v30 = vpop.f32.mrf.mxu0 }

</bundles_post_ra>
